<compile_context>
chip_gen: v6e
topology: v6e:2x2x1
jax: 0.10.0
libtpu: 0.0.40
codegen_flags: <defaults>
</compile_context>

<pallas_src>
import math
import functools

import jax
import jax.numpy as jnp
from jax import lax
from jax.experimental import pallas as pl
from jax.experimental.pallas import tpu as pltpu


def _instance_loss_kernel(z_lhs_ref, z_rhs_ref, pos_ref, out_ref, *, N, B, TM,
                          temperature, tau_plus, beta, exp_dtype):
    blk = pl.program_id(0)
    r0 = blk * TM                                   # first global row of this slab

    inv_t = 1.0 / temperature
    nn = N - 2                                      # negatives per row
    inv_nn = 1.0 / nn
    inv_one_minus_tau = 1.0 / (1.0 - tau_plus)
    clamp_min = nn * math.e ** (-1.0 / temperature)
    neg_big = jnp.float32(-1e30)

    z_lhs = z_lhs_ref[...]                          # (TM, D), caller's dtype
    z_rhs = z_rhs_ref[...]                          # (N, D), resident full z
    # sim = (z_slab @ z.T) / T -- MXU matmul with f32 accumulation.
    sim = lax.dot_general(z_lhs, z_rhs, (((1,), (1,)), ((), ())),
                          preferred_element_type=jnp.float32) * inv_t      # (TM, N)
    neg_full = jnp.exp(sim)                                                # EUP exp #1

    # Negatives mask without any N^2 modulo: positive partner of global row r is r +/- B,
    # so compare (col - local_row) against three scalars (r0, r0+B, r0+B-N).
    lrow = lax.broadcasted_iota(jnp.int32, (TM, N), 0)
    col = lax.broadcasted_iota(jnp.int32, (TM, N), 1)
    dl = col - lrow
    mask = (dl != r0) & (dl != r0 + B) & (dl != r0 + B - N)

    pos = pos_ref[...]                              # (TM, 1) f32, exp(<z_i, z_j>/T)

    # ---- hard estimator (debiased, reweighted negatives) ----
    if beta == 1.0:
        imp = jnp.where(mask, neg_full, 0.0)        # neg ** 1
    else:
        imp = jnp.where(mask, jnp.exp(beta * sim), 0.0)   # neg ** beta (no log needed)
    reweight_num = jnp.sum(imp * neg_full, axis=-1, keepdims=True)
    imp_mean = jnp.sum(imp, axis=-1, keepdims=True) * inv_nn
    reweight_neg = reweight_num / imp_mean                    # (TM, 1)
    ng = (reweight_neg - (tau_plus * nn) * pos) * inv_one_minus_tau
    ng = jnp.maximum(ng, clamp_min)
    t1 = jnp.sum(-jnp.log(pos / (pos + ng)))                  # slab partial of term1

    # ---- cross-softmax consistency term ----
    #   p = softmax(neg/0.04), logq = log_softmax(neg/0.1) over masked-in columns.
    # With d1 = 25*neg - m1 (m1 = masked max of 25*neg), the m1 terms cancel:
    #   -sum(p * logq) = log(sum(exp(0.4*d1))) - 0.4 * sum(e1*d1) / sum(e1)
    mneg = jnp.max(jnp.where(mask, neg_full, 0.0), axis=-1, keepdims=True)
    d1 = jnp.where(mask, (neg_full - mneg) * 25.0, neg_big)   # <= 0 on mask, huge-neg off
    e1 = jnp.exp(d1.astype(exp_dtype)).astype(jnp.float32)    # EUP exp #2
    e2 = jnp.exp((0.4 * d1).astype(exp_dtype))                # EUP exp #3
    s1 = jnp.sum(e1, axis=-1, keepdims=True)                  # f32 row sums
    sd = jnp.sum(e1 * d1, axis=-1, keepdims=True)
    s2 = jnp.sum(e2.astype(jnp.float32), axis=-1, keepdims=True)
    t2 = jnp.sum(jnp.log(s2) - 0.4 * sd / s1)                 # slab partial of term2

    # Lane-dense per-block partial (same scalar in every lane); wrapper sums [:, 0, 0].
    out_ref[...] = jnp.broadcast_to((t1 + t2).astype(jnp.float32), out_ref.shape)


def _pick_row_tile(N, cap):
    """Largest divisor of N that is <= cap, preferring multiples of 8."""
    cap = max(1, min(int(cap), N))
    best_any, best_8 = 1, 0
    d = 1
    while d * d <= N:
        if N % d == 0:
            for c in (d, N // d):
                if c <= cap:
                    if c > best_any:
                        best_any = c
                    if c % 8 == 0 and c > best_8:
                        best_8 = c
        d += 1
    return best_8 if best_8 else best_any


def instance_loss(z_i, z_j, *, batch_size, temperature, tau_plus, beta,
                  estimator="hard"):
    if estimator != "hard":
        raise Exception("Invalid estimator selected. Please use any of [hard, easy]")
    assert z_i.shape == z_j.shape and z_i.shape[0] == batch_size
    B = int(batch_size)
    N = 2 * B
    D = int(z_i.shape[1])

    # TODO(synk): pass z_i / z_j as two separate pallas inputs to skip this XLA concat
    # (lowest-priority per review; needs a half-aware LHS index_map).
    z = jnp.concatenate([z_i, z_j], axis=0)                   # (N, D), caller's dtype

    # O(N*D) prologue: positives exactly as the reference computes them.
    # TODO(synk): fold back into the kernel via a partner-slab BlockSpec
    # (block index (i + B//TM) % (N//TM)) once B % TM == 0 is guaranteed.
    pos = jnp.exp(jnp.sum(z_i.astype(jnp.float32) * z_j.astype(jnp.float32), axis=-1)
                  / float(temperature))
    pos = jnp.concatenate([pos, pos], axis=0).reshape(N, 1)

    itemsize = jnp.dtype(z.dtype).itemsize

    # Device-aware VMEM capacity (v5e/v6e: 128 MiB, v7x: 64 MiB per TensorCore).
    try:
        vmem_cap = int(pltpu.get_tpu_info().vmem_capacity_bytes)
    except Exception:
        vmem_cap = 64 * 2**20                                  # v7x-safe fallback

    kind = jax.devices()[0].device_kind.lower()
    # bf16 EUP only exists on v6e/v7x; keep f32 exps for small N where averaging
    # does not damp bf16 rounding and the EUP is nowhere near saturated anyway.
    use_bf16_exp = (("v6" in kind) or ("v7" in kind) or ("7x" in kind)) and N >= 256
    exp_dtype = jnp.bfloat16 if use_bf16_exp else jnp.float32

    # Row tile: biggest divisor of N (preferring multiples of 8) whose ~16-17 live
    # f32/int32 (TM, N) temporaries fit in ~70% of VMEM next to the resident (N, D) RHS.
    per_row_bytes = (16 + (1 if float(beta) != 1.0 else 0)) * 4 * N
    resident_bytes = 2 * N * D * itemsize + (2 << 20)
    tm_by_mem = (int(0.70 * vmem_cap) - resident_bytes) // max(per_row_bytes, 1)
    tm_target = int(max(8, min(512, tm_by_mem)))
    TM = _pick_row_tile(N, tm_target)
    assert N % TM == 0
    nb = N // TM
    # TODO(synk): for N so large that even TM=8 rows of temporaries exceed VMEM, add a
    # second (column) grid axis with in-kernel online accumulation of the row reductions.

    est_bytes = (resident_bytes + 2 * TM * D * itemsize + TM * per_row_bytes
                 + 2 * TM * 4 + 2 * 8 * 128 * 4 + (2 << 20))
    vmem_limit = int(min(int(0.9 * vmem_cap), max(32 * 2**20, est_bytes)))

    n_trans = 3 * N * N + (N * N if float(beta) != 1.0 else 0) + 4 * N
    cost = pl.CostEstimate(
        flops=2 * N * N * D + 40 * N * N,
        transcendentals=n_trans,
        bytes_accessed=2 * N * D * itemsize + N * 4 + nb * 8 * 128 * 4)

    kernel = functools.partial(
        _instance_loss_kernel, N=N, B=B, TM=TM,
        temperature=float(temperature), tau_plus=float(tau_plus), beta=float(beta),
        exp_dtype=exp_dtype)

    partials = pl.pallas_call(
        kernel,
        grid=(nb,),
        out_shape=jax.ShapeDtypeStruct((nb, 8, 128), jnp.float32),
        in_specs=[pl.BlockSpec((TM, D), lambda i: (i, 0)),     # row slab (LHS)
                  pl.BlockSpec((N, D), lambda i: (0, 0)),      # full z, resident (RHS)
                  pl.BlockSpec((TM, 1), lambda i: (i, 0))],    # positives for the slab
        out_specs=pl.BlockSpec((1, 8, 128), lambda i: (i, 0, 0)),
        compiler_params=pltpu.CompilerParams(
            dimension_semantics=("parallel",),                 # 2x on v7x; harmless on 1-TC
            vmem_limit_bytes=vmem_limit),
        cost_estimate=cost,
    )(z, z, pos)

    # Finish: sum per-block partials and apply the (mean1 + mean2) / 2 scaling.
    return jnp.sum(partials[:, 0, 0]) * (0.5 / N)


def _reference_loss(z_i, z_j, *, batch_size, temperature, tau_plus, beta):
    """Pure-JAX mirror of the PyTorch module (criterion with estimator='hard')."""
    z = jnp.concatenate([z_i, z_j], axis=0).astype(jnp.float32)
    N = 2 * batch_size
    sim = (z @ z.T) / temperature
    neg_full = jnp.exp(sim)
    row = jnp.arange(N)[:, None]
    col = jnp.arange(N)[None, :]
    pos_col = (row + batch_size) % N
    mask = (col != row) & (col != pos_col)
    pos = jnp.exp(jnp.sum(z_i.astype(jnp.float32) * z_j.astype(jnp.float32), axis=-1)
                  / temperature)
    pos = jnp.concatenate([pos, pos], axis=0)
    nn = N - 2
    imp = jnp.where(mask, neg_full ** beta, 0.0)
    reweight_neg = jnp.sum(imp * neg_full, -1) / (jnp.sum(imp, -1) / nn)
    ng = (-tau_plus * nn * pos + reweight_neg) / (1.0 - tau_plus)
    ng = jnp.maximum(ng, nn * math.e ** (-1.0 / temperature))
    term1 = jnp.mean(-jnp.log(pos / (pos + ng)))
    x1 = jnp.where(mask, neg_full / 0.04, -jnp.inf)
    x2 = jnp.where(mask, neg_full / 0.1, -jnp.inf)
    p = jax.nn.softmax(x1, axis=-1)
    logq = jax.nn.log_softmax(x2, axis=-1)
    term2 = jnp.mean(-jnp.sum(jnp.where(mask, p * logq, 0.0), axis=-1))
    return (term1 + term2) * 0.5


if __name__ == "__main__":
    batch_size = 4
    hidden = 32
    temperature = 0.5
    tau_plus = 0.1
    beta = 1.0

    key = jax.random.PRNGKey(0)
    k1, k2 = jax.random.split(key)
    z_i = jax.random.normal(k1, (batch_size, hidden), dtype=jnp.float32)
    z_j = jax.random.normal(k2, (batch_size, hidden), dtype=jnp.float32)
    # L2-normalize embeddings (standard for contrastive losses; keeps exp(sim/T) bounded).
    z_i = z_i / jnp.linalg.norm(z_i, axis=-1, keepdims=True)
    z_j = z_j / jnp.linalg.norm(z_j, axis=-1, keepdims=True)

    loss = instance_loss(z_i, z_j,
                         batch_size=batch_size,
                         temperature=temperature,
                         tau_plus=tau_plus,
                         beta=beta,
                         estimator="hard")
    loss = jax.block_until_ready(loss)

    ref = _reference_loss(z_i, z_j, batch_size=batch_size, temperature=temperature,
                          tau_plus=tau_plus, beta=beta)
    assert jnp.isfinite(loss), loss
    assert abs(float(loss) - float(ref)) <= 2e-2 * max(1.0, abs(float(ref))), (loss, ref)
    print("KERNEL_OK")
</pallas_src>

<mosaic_0001>
module attributes {stable_mosaic.version = 11 : i64} {
  func.func @_instance_loss_kernel(%arg0: i32, %arg1: memref<8x32xf32, #tpu.memory_space<vmem>>, %arg2: memref<8x32xf32, #tpu.memory_space<vmem>>, %arg3: memref<8x1xf32, #tpu.memory_space<vmem>>, %arg4: memref<1x8x128xf32, #tpu.memory_space<vmem>>) attributes {dimension_semantics = [#tpu.dimension_semantics<parallel>], iteration_bounds = array<i64: 1>, scalar_prefetch = 0 : i64, scratch_operands = 0 : i64, tpu.core_type = #tpu.core_type<tc>, window_params = [{transform_indices = @transform_0, window_bounds = array<i64: 8, 32>}, {pipeline_mode = #tpu.pipeline_mode<synchronous>, transform_indices = @transform_1, window_bounds = array<i64: 8, 32>}, {transform_indices = @transform_2, window_bounds = array<i64: 8, 1>}, {transform_indices = @transform_3, window_bounds = array<i64: 1, 8, 128>}]} {
    %c8_i32 = arith.constant 8 : i32
    %0 = arith.muli %arg0, %c8_i32 : i32
    %c0 = arith.constant 0 : index
    %c0_0 = arith.constant 0 : index
    %1 = vector.load %arg1[%c0, %c0_0] : memref<8x32xf32, #tpu.memory_space<vmem>>, vector<8x32xf32>
    %c0_1 = arith.constant 0 : index
    %c0_2 = arith.constant 0 : index
    %2 = vector.load %arg2[%c0_1, %c0_2] : memref<8x32xf32, #tpu.memory_space<vmem>>, vector<8x32xf32>
    %cst = arith.constant dense<0.000000e+00> : vector<8x8xf32>
    %3 = tpu.matmul %1, %2, %cst {dimension_numbers = #tpu.dot_dimension_numbers<[1], [1], [0], [0], [0, 0, 1, 0], [], []>} : vector<8x32xf32>, vector<8x32xf32>, vector<8x8xf32> -> vector<8x8xf32>
    %cst_3 = arith.constant 2.000000e+00 : f32
    %4 = vector.broadcast %cst_3 : f32 to vector<8x8xf32>
    %5 = arith.mulf %3, %4 : vector<8x8xf32>
    %6 = math.exp %5 : vector<8x8xf32>
    %7 = tpu.iota {dimensions = array<i32: 0>} : vector<8x8xi32>
    %8 = tpu.iota {dimensions = array<i32: 1>} : vector<8x8xi32>
    %9 = arith.subi %8, %7 : vector<8x8xi32>
    %10 = vector.broadcast %0 : i32 to vector<8x8xi32>
    %11 = arith.cmpi ne, %9, %10 : vector<8x8xi32>
    %c4_i32 = arith.constant 4 : i32
    %12 = arith.addi %0, %c4_i32 : i32
    %13 = vector.broadcast %12 : i32 to vector<8x8xi32>
    %14 = arith.cmpi ne, %9, %13 : vector<8x8xi32>
    %15 = arith.andi %11, %14 : vector<8x8xi1>
    %c4_i32_4 = arith.constant 4 : i32
    %16 = arith.addi %0, %c4_i32_4 : i32
    %c8_i32_5 = arith.constant 8 : i32
    %17 = arith.subi %16, %c8_i32_5 : i32
    %18 = vector.broadcast %17 : i32 to vector<8x8xi32>
    %19 = arith.cmpi ne, %9, %18 : vector<8x8xi32>
    %20 = arith.andi %15, %19 : vector<8x8xi1>
    %c0_6 = arith.constant 0 : index
    %c0_7 = arith.constant 0 : index
    %21 = vector.load %arg3[%c0_6, %c0_7] : memref<8x1xf32, #tpu.memory_space<vmem>>, vector<8x1xf32>
    %cst_8 = arith.constant 0.000000e+00 : f32
    %22 = vector.broadcast %cst_8 : f32 to vector<8x8xf32>
    %23 = arith.select %20, %6, %22 : vector<8x8xi1>, vector<8x8xf32>
    %24 = arith.mulf %23, %6 : vector<8x8xf32>
    %cst_9 = arith.constant dense<0.000000e+00> : vector<8xf32>
    %25 = vector.multi_reduction <add>, %24, %cst_9 [1] : vector<8x8xf32> to vector<8xf32>
    %26 = vector.shape_cast %25 : vector<8xf32> to vector<8x1xf32>
    %cst_10 = arith.constant dense<0.000000e+00> : vector<8xf32>
    %27 = vector.multi_reduction <add>, %23, %cst_10 [1] : vector<8x8xf32> to vector<8xf32>
    %28 = vector.shape_cast %27 : vector<8xf32> to vector<8x1xf32>
    %cst_11 = arith.constant 0.166666672 : f32
    %29 = vector.broadcast %cst_11 : f32 to vector<8x1xf32>
    %30 = arith.mulf %28, %29 : vector<8x1xf32>
    %31 = arith.divf %26, %30 : vector<8x1xf32>
    %cst_12 = arith.constant 6.000000e-01 : f32
    %32 = vector.broadcast %cst_12 : f32 to vector<8x1xf32>
    %33 = arith.mulf %32, %21 : vector<8x1xf32>
    %34 = arith.subf %31, %33 : vector<8x1xf32>
    %cst_13 = arith.constant 1.11111116 : f32
    %35 = vector.broadcast %cst_13 : f32 to vector<8x1xf32>
    %36 = arith.mulf %34, %35 : vector<8x1xf32>
    %cst_14 = arith.constant 0.812011718 : f32
    %37 = vector.broadcast %cst_14 : f32 to vector<8x1xf32>
    %38 = arith.maximumf %36, %37 : vector<8x1xf32>
    %39 = arith.addf %21, %38 : vector<8x1xf32>
    %40 = arith.divf %21, %39 : vector<8x1xf32>
    %41 = math.log %40 : vector<8x1xf32>
    %cst_15 = arith.constant 0.000000e+00 : f32
    %42 = vector.broadcast %cst_15 : f32 to vector<8x1xf32>
    %43 = arith.subf %42, %41 : vector<8x1xf32>
    %44 = vector.shape_cast %43 : vector<8x1xf32> to vector<1x8x1xf32>
    %cst_16 = arith.constant dense<0.000000e+00> : vector<1xf32>
    %45 = vector.multi_reduction <add>, %44, %cst_16 [1, 2] : vector<1x8x1xf32> to vector<1xf32>
    %46 = vector.shape_cast %45 : vector<1xf32> to vector<1x1x1xf32>
    %47 = vector.extract %46[0, 0, 0] : f32 from vector<1x1x1xf32>
    %cst_17 = arith.constant 0.000000e+00 : f32
    %48 = vector.broadcast %cst_17 : f32 to vector<8x8xf32>
    %49 = arith.select %20, %6, %48 : vector<8x8xi1>, vector<8x8xf32>
    %cst_18 = arith.constant dense<0xFF800000> : vector<8xf32>
    %50 = vector.multi_reduction <maximumf>, %49, %cst_18 [1] : vector<8x8xf32> to vector<8xf32>
    %51 = vector.shape_cast %50 : vector<8xf32> to vector<8x1xf32>
    %52 = vector.broadcast %51 : vector<8x1xf32> to vector<8x8xf32>
    %53 = arith.subf %6, %52 : vector<8x8xf32>
    %cst_19 = arith.constant 2.500000e+01 : f32
    %54 = vector.broadcast %cst_19 : f32 to vector<8x8xf32>
    %55 = arith.mulf %53, %54 : vector<8x8xf32>
    %cst_20 = arith.constant -1.000000e+30 : f32
    %56 = vector.broadcast %cst_20 : f32 to vector<8x8xf32>
    %57 = arith.select %20, %55, %56 : vector<8x8xi1>, vector<8x8xf32>
    %58 = math.exp %57 : vector<8x8xf32>
    %cst_21 = arith.constant 4.000000e-01 : f32
    %59 = vector.broadcast %cst_21 : f32 to vector<8x8xf32>
    %60 = arith.mulf %59, %57 : vector<8x8xf32>
    %61 = math.exp %60 : vector<8x8xf32>
    %cst_22 = arith.constant dense<0.000000e+00> : vector<8xf32>
    %62 = vector.multi_reduction <add>, %58, %cst_22 [1] : vector<8x8xf32> to vector<8xf32>
    %63 = vector.shape_cast %62 : vector<8xf32> to vector<8x1xf32>
    %64 = arith.mulf %58, %57 : vector<8x8xf32>
    %cst_23 = arith.constant dense<0.000000e+00> : vector<8xf32>
    %65 = vector.multi_reduction <add>, %64, %cst_23 [1] : vector<8x8xf32> to vector<8xf32>
    %66 = vector.shape_cast %65 : vector<8xf32> to vector<8x1xf32>
    %cst_24 = arith.constant dense<0.000000e+00> : vector<8xf32>
    %67 = vector.multi_reduction <add>, %61, %cst_24 [1] : vector<8x8xf32> to vector<8xf32>
    %68 = vector.shape_cast %67 : vector<8xf32> to vector<8x1xf32>
    %69 = math.log %68 : vector<8x1xf32>
    %cst_25 = arith.constant 4.000000e-01 : f32
    %70 = vector.broadcast %cst_25 : f32 to vector<8x1xf32>
    %71 = arith.mulf %70, %66 : vector<8x1xf32>
    %72 = arith.divf %71, %63 : vector<8x1xf32>
    %73 = arith.subf %69, %72 : vector<8x1xf32>
    %74 = vector.shape_cast %73 : vector<8x1xf32> to vector<1x8x1xf32>
    %cst_26 = arith.constant dense<0.000000e+00> : vector<1xf32>
    %75 = vector.multi_reduction <add>, %74, %cst_26 [1, 2] : vector<1x8x1xf32> to vector<1xf32>
    %76 = vector.shape_cast %75 : vector<1xf32> to vector<1x1x1xf32>
    %77 = vector.extract %76[0, 0, 0] : f32 from vector<1x1x1xf32>
    %78 = arith.addf %47, %77 : f32
    %79 = vector.broadcast %78 : f32 to vector<1x8x128xf32>
    %c0_27 = arith.constant 0 : index
    %c0_28 = arith.constant 0 : index
    %c0_29 = arith.constant 0 : index
    %80 = vector.load %arg4[%c0_27, %c0_28, %c0_29] : memref<1x8x128xf32, #tpu.memory_space<vmem>>, vector<1x8x128xf32>
    tpu.vector_store %arg4[%c0_27, %c0_28, %c0_29], %79 {strides = array<i32>} : memref<1x8x128xf32, #tpu.memory_space<vmem>>, vector<1x8x128xf32>,
    return
  }
  func.func @transform_0(%arg0: i32) -> (i32, i32) {
    %c0_i32 = arith.constant 0 : i32
    %c0_i32_0 = arith.constant 0 : i32
    return %arg0, %c0_i32 : i32, i32
  }
  func.func @transform_1(%arg0: i32) -> (i32, i32) {
    %c0_i32 = arith.constant 0 : i32
    %c0_i32_0 = arith.constant 0 : i32
    %c0_i32_1 = arith.constant 0 : i32
    return %c0_i32, %c0_i32_0 : i32, i32
  }
  func.func @transform_2(%arg0: i32) -> (i32, i32) {
    %c0_i32 = arith.constant 0 : i32
    %c0_i32_0 = arith.constant 0 : i32
    return %arg0, %c0_i32 : i32, i32
  }
  func.func @transform_3(%arg0: i32) -> (i32, i32, i32) {
    %c0_i32 = arith.constant 0 : i32
    %c0_i32_0 = arith.constant 0 : i32
    %c0_i32_1 = arith.constant 0 : i32
    return %arg0, %c0_i32, %c0_i32_0 : i32, i32, i32
  }
}

</mosaic_0001>

<bundles_post_ra>
// kernel: tpu_custom_call.1
= control target key start
LH: loop header
LB: loop body
LE: loop exit
PB: predicated region body
PF: predicated region fallthrough
CT: control target
= control target key end

     0   :  { %8 = vsyncpa [#allocation3], 0  ;;  %s333_s0 = inlined_call_operand.vmem [shape: f32[8,32], index: 0, kind: input, shape index: {}]   ;;  %s334_s1 = inlined_call_operand.hbm [shape: f32[8,32], index: 1, kind: input, shape index: {}]   ;;  %s335_s2 = inlined_call_operand.vmem [shape: f32[8,1], index: 2, kind: input, shape index: {}]   ;;  %s336_s3 = inlined_call_operand.hbm [shape: f32[1,8,128], index: 3, kind: output, shape index: {}]  }
   0x1   :  { %9 = vsyncpa [#allocation4], 0  ;;  %s291_s12 = smov [#allocation2]  }
   0x2   :  { %s18_s13 = sshll.u32 %s291_s12, 4  ;;  %s19_s13 = int_to_ptr.vmem [resolvable:$true] %s18_s13 }
   0x3   :  { %s255_s14 = scalar_lea.vmem %s19_s13, 128  ;;  %p260_p1 = scmp.lt.s32.totalorder %s19_s13, %s19_s13 }
   0x4   :  { %p256_p0 = scmp.ne.s32.totalorder %s19_s13, %s255_s14  ;;  %p261_p2 = scmp.lt.s32.totalorder %s255_s14, %s255_s14 }
   0x6   :  { %p262_p3 = por %p261_p2, %p260_p1 }
   0x8   :  { %p263_p4 = pnand %p262_p3, %p256_p0 }
   0xa   :  { %266 = shalt.err (!%p263_p4)
}
   0xb   :  { %21 = dma.hbm_to_vmem [thread:$0]  %s334_s1, 128, %s19_s13, [#allocation3]  }
   0xc   :  { %287 = dma.done.wait [#allocation3], 128  }
   0xd   :  { %288 = vsyncadd [#allocation3], 4294967168  ;;  %v292_v0 = vmov 0.0   ;;  %vm293_vm0 = vmmov 0   ;;  %vm30_vm1 = vcmask 261120   ;;  %v29_v1 = vld [vmem:[#allocation2] sm:$0xff]  ;;  %v110_v3 = vlaneseq }
   0xe   :  { %218 = vmatprep.subr.mxu0 %v292_v0  ;;  %220 = vmatprep.mubr.msk.f32.mxu0 %vm293_vm0, %v292_v0  ;;  %v28_v2 = vld [vmem:[%s333_s0] sm:$0xff]  ;;  %vm128_vm7 = vcmask 64512   ;;  %vm148_vm8 = vcmask 7168   ;;  %s294_s19 = smov [#allocation5]  }
   0xf   :  { %219 = vmatpush3.xpose.msk.msra.mxu0 %vm30_vm1, %v29_v1  ;;  %v111_v7 = vshrl.u32 %v110_v3, 7  ;;  %v113_v8 = vand.u32 127, %v110_v3  ;;  %v125_v26 = vld [vmem:[%s335_s2] sm:$0xff]  ;;  %s205_s20 = sshll.u32 %s294_s19, 4  ;;  %s206_s20 = int_to_ptr.vmem [resolvable:$true] %s205_s20 }
  0x10   :  { %v138_v27 = vmul.f32 0.6, %v125_v26  ;;  %s267_s23 = scalar_lea.vmem %s206_s20, 128  ;;  %p272_p6 = scmp.lt.s32.totalorder %s206_s20, %s206_s20 }
  0x11   :  { %v114_v10 = vsub.s32 %v113_v8, %v111_v7  ;;  %p268_p5 = scmp.ne.s32.totalorder %s206_s20, %s267_s23  ;;  %p273_p7 = scmp.lt.s32.totalorder %s267_s23, %s267_s23 }
  0x12   :  { %221 = vmatmul.mubr.msk.f32.vlgmr.msra.gmra.mxu0 %vm30_vm1, %v28_v2 }
  0x13   :  { %vm116_vm2 = vcmp.ne.s32.totalorder %v114_v10, 0  ;;  %vm119_vm3 = vcmp.ne.s32.totalorder %v114_v10, 4  ;;  %vm123_vm5 = vcmp.ne.s32.totalorder %v114_v10, 4294967292  ;;  %p274_p8 = por %p273_p7, %p272_p6 }
  0x14   :  { %vm120_vm4 = vmand %vm116_vm2, %vm119_vm3 }
  0x15   :  { %vm124_vm6 = vmand %vm120_vm4, %vm123_vm5  ;;  %p275_p9 = pnand %p274_p8, %p268_p5 }
  0xd2   :  { %v103_v4 = vpop.f32.mrf.mxu0 }
  0xd3   :  { %v107_v5 = vmul.f32 2.0, %v103_v4 }
  0xd4   :  { %v222_v6 = vpop.f32.mrf.mxu0 }
  0xd5   :  { %v108_v9 = vmul.f32 1.442695, %v107_v5 }
  0xd7   :  { %231 = vpow2.f32 %v108_v9 }
  0xe4   :  { %v232_v11 = vpop.eup %231 }
  0xe5   :  { %v126_v12 = vsel %vm124_vm6, %v232_v11, 0.0 }
  0xe6   :  { %v159_v13 = vsel %vm128_vm7, %v126_v12, -inf  ;;  %v127_v14 = vmul.f32 %v232_v11, %v126_v12  ;;  %v132_v16 = vsel %vm128_vm7, %v126_v12, 0.0 }
  0xe7   :  { %160 = vmax.xlane.f32.xlu0 %v159_v13 }
  0xe8   :  { %v129_v15 = vsel %vm128_vm7, %v127_v14, 0.0 }
  0xe9   :  { %130 = vadd.xlane.f32.xlu1 %v129_v15 }
  0xeb   :  { %133 = vadd.xlane.f32.xlu0 %v132_v16 }
 0x170   :  { %v161_v17 = vpop.xlane.xlu0 %160 }
 0x171   :  { %v162_v18 = vsub.f32 %v232_v11, %v161_v17 }
 0x172   :  { %v131_v29 = vpop.xlane.xlu1 %130 }
 0x173   :  { %v163_v19 = vmul.f32 25.0, %v162_v18 }
 0x174   :  { %v134_v20 = vpop.xlane.xlu0 %133 }
 0x175   :  { %v164_v21 = vsel %vm124_vm6, %v163_v19, -1e+30  ;;  %v135_v22 = vmul.f32 0.16666667, %v134_v20 }
 0x176   :  { %v165_v23 = vmul.f32 1.442695, %v164_v21  ;;  %v167_v24 = vmul.f32 0.4, %v164_v21 }
 0x177   :  { %233 = vrcp.f32 %v135_v22 }
 0x178   :  { %235 = vpow2.f32 %v165_v23  ;;  %v168_v25 = vmul.f32 1.442695, %v167_v24 }
 0x17a   :  { %237 = vpow2.f32 %v168_v25 }
 0x184   :  { %v234_v28 = vpop.eup %233 }
 0x185   :  { %v236_v30 = vpop.eup %235  ;;  %v137_v31 = vmul.f32 %v234_v28, %v131_v29 }
 0x186   :  { %v170_v32 = vsel %vm128_vm7, %v236_v30, 0.0  ;;  %v173_v33 = vmul.f32 %v236_v30, %v164_v21 }
 0x187   :  { %v238_v34 = vpop.eup %237  ;;  %171 = vadd.xlane.f32.xlu1 %v170_v32  ;;  %v139_v35 = vsub.f32 %v137_v31, %v138_v27 }
 0x188   :  { %v177_v36 = vsel %vm128_vm7, %v238_v34, 0.0  ;;  %v174_v38 = vsel %vm128_vm7, %v173_v33, 0.0 }
 0x189   :  { %178 = vadd.xlane.f32.xlu0 %v177_v36  ;;  %v140_v37 = vmul.f32 1.1111112, %v139_v35 }
 0x18b   :  { %175 = vadd.xlane.f32.xlu1 %v174_v38  ;;  %v141_v39 = vmax.f32 %v140_v37, 0.8120117 }
 0x18d   :  { %v142_v40 = vadd.f32 %v141_v39, %v125_v26 }
 0x18f   :  { %239 = vrcp.f32 %v142_v40 }
 0x19c   :  { %v240_v41 = vpop.eup %239 }
 0x19d   :  { %v144_v42 = vmul.f32 %v240_v41, %v125_v26 }
 0x19f   :  { %241 = vlog2.f32 %v144_v42 }
 0x1ac   :  { %v242_v43 = vpop.eup %241 }
 0x1ad   :  { %v146_v44 = vmul.f32 0.6931472, %v242_v43 }
 0x1af   :  { %v147_v45 = vsub.f32 0.0, %v146_v44 }
 0x1b1   :  { %v149_v46 = vsel %vm148_vm8, %v147_v45, 0.0 }
 0x1b2   :  { %150 = vadd.xlane.f32.xlu0 %v149_v46 }
 0x210   :  { %v172_v47 = vpop.xlane.xlu1 %171 }
 0x211   :  { %243 = vrcp.f32 %v172_v47 }
 0x212   :  { %v179_v48 = vpop.xlane.xlu0 %178 }
 0x213   :  { %245 = vlog2.f32 %v179_v48 }
 0x214   :  { %v176_v49 = vpop.xlane.xlu1 %175 }
 0x215   :  { %v182_v51 = vmul.f32 0.4, %v176_v49 }
 0x21e   :  { %v244_v50 = vpop.eup %243 }
 0x21f   :  { %v184_v54 = vmul.f32 %v244_v50, %v182_v51 }
 0x220   :  { %v246_v52 = vpop.eup %245 }
 0x221   :  { %v181_v53 = vmul.f32 0.6931472, %v246_v52 }
 0x223   :  { %v185_v55 = vsub.f32 %v181_v53, %v184_v54 }
 0x225   :  { %v186_v56 = vsel %vm148_vm8, %v185_v55, 0.0 }
 0x226   :  { %187 = vadd.xlane.f32.xlu1 %v186_v56 }
 0x23b   :  { %v151_v57 = vpop.xlane.xlu0 %150 }
 0x23c   :  { %v152_v58 = vrot.slane %v151_v57, 4 }
 0x23e   :  { %v153_v59 = vadd.f32 %v152_v58, %v151_v57 }
 0x240   :  { %v154_v60 = vrot.slane %v153_v59, 2 }
 0x242   :  { %v155_v61 = vadd.f32 %v154_v60, %v153_v59 }
 0x244   :  { %v156_v62 = vrot.slane %v155_v61, 1 }
 0x246   :  { %v157_v63 = vadd.f32 %v156_v62, %v155_v61 }
 0x248   :  { %223 = vpush %v157_v63 }
 0x279   :  { %s224_s2 = spop %223 }
 0x2af   :  { %v188_v0 = vpop.xlane.xlu1 %187 }
 0x2b0   :  { %v189_v1 = vrot.slane %v188_v0, 4 }
 0x2b2   :  { %v190_v2 = vadd.f32 %v189_v1, %v188_v0 }
 0x2b4   :  { %v191_v3 = vrot.slane %v190_v2, 2 }
 0x2b6   :  { %v192_v4 = vadd.f32 %v191_v3, %v190_v2 }
 0x2b8   :  { %v193_v5 = vrot.slane %v192_v4, 1 }
 0x2ba   :  { %v194_v6 = vadd.f32 %v193_v5, %v192_v4 }
 0x2bc   :  { %225 = vpush %v194_v6 }
 0x2ed   :  { %s226_s21 = spop %225 }
 0x2ee   :  { %s196_s22 = sadd.f32 %s226_s21, %s224_s2 }
 0x2f0   :  { %v197_v7 = vstv %s196_s22 }
 0x2f1   :  { %198 = vst [vmem:[#allocation5] sm:$0xff] %v197_v7 }
 0x2f2   :  { %278 = shalt.err (!%p275_p9)
}
 0x2f3   :  { %208 = dma.vmem_to_hbm [thread:$0]  %s206_s20, 128, %s336_s3, [#allocation4]  }
 0x2f4   :  { %289 = dma.done.wait [#allocation4], 128  }
 0x2f5   :  { %290 = vsyncadd [#allocation4], 4294967168 }
 0x2f6   :  { %212 = vsyncpa [#allocation3], 1 }
 0x2f7   :  { %213 = vsyncpa [#allocation4], 1 }

</bundles_post_ra>
